<compile_context>
chip_gen: v7x
topology: tpu7x:2x2x1
jax: 0.10.0
libtpu: 0.0.40
codegen_flags: <defaults>
</compile_context>

<pallas_src>
import jax
import jax.numpy as jnp
from jax.experimental import pallas as pl
from jax.experimental.pallas import tpu as pltpu


def _round_up(x, m):
    return (x + m - 1) // m * m


# ---------------------------------------------------------------------------
# Text encoder kernel (tiny, runs once): pooled tokens -> projection ->
# L2-normalized embedding. Everything fits in VMEM, grid=().
# ---------------------------------------------------------------------------
def _text_encode_kernel(txt_ref, wt_ref, out_ref):
    emb = jnp.dot(txt_ref[...], wt_ref[...], preferred_element_type=jnp.float32)
    inv = jax.lax.rsqrt(jnp.sum(emb * emb, axis=-1, keepdims=True) + 1e-8)
    out_ref[...] = (emb * inv).astype(out_ref.dtype)


# ---------------------------------------------------------------------------
# Main kernel: tiled over (M image tiles, D_img reduction tiles).
#   img_ref : [TM, TK]      bf16 image-pixel tile
#   wi_ref  : [TK, E]       bf16 image-projection weight tile
#   txtn_ref: [N_pad, E]    f32 normalized text embeddings (constant block,
#                           stays VMEM-resident across the whole grid)
#   out_ref : [TM, N_pad]   f32 score tile (written on the last K step)
#   acc_ref : [TM, E]       f32 accumulator scratch
# ---------------------------------------------------------------------------
def _image_score_kernel(img_ref, wi_ref, txtn_ref, out_ref, acc_ref):
    k = pl.program_id(1)

    @pl.when(k == 0)
    def _():
        acc_ref[...] = jnp.zeros_like(acc_ref)

    # bf16 x bf16 -> f32 accumulation on the MXU.
    acc_ref[...] += jnp.dot(img_ref[...], wi_ref[...],
                            preferred_element_type=jnp.float32)

    @pl.when(k == pl.num_programs(1) - 1)
    def _():
        img_emb = acc_ref[...]
        img_norm = img_emb * jax.lax.rsqrt(
            jnp.sum(img_emb * img_emb, axis=-1, keepdims=True) + 1e-8)
        # Contract on the shared E axis of both operands (transposed-RHS
        # contraction feeds the MXU directly, no XLU transpose of txt_norm).
        out_ref[...] = jax.lax.dot_general(
            img_norm, txtn_ref[...],
            dimension_numbers=(((1,), (1,)), ((), ())),
            preferred_element_type=jnp.float32,
        ).astype(out_ref.dtype)


def score_forward(images_nchw, text_tokens, w_img, w_txt):
    """images_nchw: [M, C, H, W] float32 (NCHW, PyTorch convention)
       text_tokens: [N, S, H_txt] float32 token features
       w_img: [C*H*W, E], w_txt: [H_txt, E]
       returns: [M, N] float32 score matrix (same as Score.forward)."""
    M = images_nchw.shape[0]
    N = text_tokens.shape[0]

    # Glue (plain JAX): flatten image pixels, mean-pool text tokens.
    img_flat = images_nchw.reshape(M, -1).astype(jnp.float32)       # [M, D_img]
    txt_pooled = jnp.mean(text_tokens.astype(jnp.float32), axis=1)  # [N, D_txt]

    D_img = img_flat.shape[1]
    D_txt = txt_pooled.shape[1]
    E = w_img.shape[1]

    # ---- padding for lane-dense tiles / output -----------------------------
    E_pad = _round_up(E, 128)
    N_pad = _round_up(N, 128)

    M_pad = _round_up(M, 8)
    tm = 256 if M_pad >= 256 else M_pad         # 256-mult tiles on big M
    M_pad = _round_up(M_pad, tm)

    D_pad = _round_up(D_img, 128)
    tk = 512 if D_pad >= 512 else D_pad         # K-reduction tile
    D_pad = _round_up(D_pad, tk)

    def pad_to(a, shape):
        pads = [(0, s - d) for d, s in zip(a.shape, shape)]
        return jnp.pad(a, pads) if any(p[1] for p in pads) else a

    # bf16 operands for the projections (halves HBM traffic on w_img).
    img_p = pad_to(img_flat, (M_pad, D_pad)).astype(jnp.bfloat16)
    wi_p = pad_to(w_img.astype(jnp.float32), (D_pad, E_pad)).astype(jnp.bfloat16)
    txt_p = pad_to(txt_pooled, (N_pad, D_txt)).astype(jnp.bfloat16)
    wt_p = pad_to(w_txt.astype(jnp.float32), (D_txt, E_pad)).astype(jnp.bfloat16)

    # ---- text path: computed once, f32 normalized embeddings ---------------
    txt_norm = pl.pallas_call(
        _text_encode_kernel,
        out_shape=jax.ShapeDtypeStruct((N_pad, E_pad), jnp.float32),
        grid=(),
        in_specs=[
            pl.BlockSpec((N_pad, D_txt), lambda: (0, 0)),
            pl.BlockSpec((D_txt, E_pad), lambda: (0, 0)),
        ],
        out_specs=pl.BlockSpec((N_pad, E_pad), lambda: (0, 0)),
    )(txt_p, wt_p)

    # ---- main tiled kernel --------------------------------------------------
    grid = (M_pad // tm, D_pad // tk)

    flops = 2 * M_pad * D_pad * E_pad + 2 * M_pad * N_pad * E_pad
    bytes_accessed = (M_pad * D_pad * 2 + D_pad * E_pad * 2
                      + N_pad * E_pad * 4 + M_pad * N_pad * 4)
    cost = pl.CostEstimate(flops=flops, transcendentals=M_pad,
                           bytes_accessed=bytes_accessed)

    # VMEM budget from actual tile bytes: double-buffered bf16 input tiles,
    # resident txt block, f32 accumulator, double-buffered output tile.
    tile_bytes = (2 * (tm * tk * 2 + tk * E_pad * 2)
                  + 2 * N_pad * E_pad * 4
                  + tm * E_pad * 4
                  + 2 * tm * N_pad * 4)
    vmem_limit = int(min(max(2 * tile_bytes, 16 << 20), 48 << 20))

    scores_padded = pl.pallas_call(
        _image_score_kernel,
        out_shape=jax.ShapeDtypeStruct((M_pad, N_pad), jnp.float32),
        grid_spec=pltpu.PrefetchScalarGridSpec(
            num_scalar_prefetch=0,
            grid=grid,
            in_specs=[
                pl.BlockSpec((tm, tk), lambda i, k: (i, k)),       # image tile
                pl.BlockSpec((tk, E_pad), lambda i, k: (k, 0)),    # w_img tile
                pl.BlockSpec((N_pad, E_pad), lambda i, k: (0, 0)),  # txt (resident)
            ],
            out_specs=pl.BlockSpec((tm, N_pad), lambda i, k: (i, 0)),
            scratch_shapes=[pltpu.VMEM((tm, E_pad), jnp.float32)],
        ),
        compiler_params=pltpu.CompilerParams(
            dimension_semantics=("parallel", "arbitrary"),
            vmem_limit_bytes=vmem_limit,
        ),
        cost_estimate=cost,
    )(img_p, wi_p, txt_norm)

    return scores_padded[:M, :N]


def _reference(images_nchw, text_tokens, w_img, w_txt):
    img = images_nchw.reshape(images_nchw.shape[0], -1) @ w_img
    txt = jnp.mean(text_tokens, axis=1) @ w_txt
    img = img / jnp.sqrt(jnp.sum(img * img, -1, keepdims=True) + 1e-8)
    txt = txt / jnp.sqrt(jnp.sum(txt * txt, -1, keepdims=True) + 1e-8)
    return img @ txt.T


if __name__ == "__main__":
    # Small shapes consistent with the module's forward: m images, n texts.
    M, C, H, W = 2, 4, 16, 16          # images (NCHW)
    N, S, H_TXT = 8, 8, 32             # texts: n texts, seq len, hidden
    E = 128                            # shared embedding dim

    key = jax.random.PRNGKey(0)
    k_img, k_txt, k_wi, k_wt = jax.random.split(key, 4)

    images = jax.random.normal(k_img, (M, C, H, W), dtype=jnp.float32)
    texts = jax.random.normal(k_txt, (N, S, H_TXT), dtype=jnp.float32)

    # Deterministic synthetic "model" parameters (no checkpoint loading).
    # TODO(synk): prepare_scoremodel / list_all_models load pretrained HF
    # checkpoints; replaced here by deterministic random projections.
    w_img = jax.random.normal(k_wi, (C * H * W, E), dtype=jnp.float32) * 0.02
    w_txt = jax.random.normal(k_wt, (H_TXT, E), dtype=jnp.float32) * 0.02

    scores = score_forward(images, texts, w_img, w_txt)
    jax.block_until_ready(scores)

    ref = _reference(images, texts, w_img, w_txt)
    assert scores.shape == (M, N)
    # bf16 projections (f32 accumulation) vs f32 reference: cosine scores in
    # [-1, 1] agree to well under 2e-2 absolute.
    assert jnp.allclose(scores, ref, atol=2e-2, rtol=2e-2)

    print("KERNEL_OK")
</pallas_src>

<mosaic_0001>
module attributes {stable_mosaic.version = 11 : i64} {
  func.func @_text_encode_kernel(%arg0: memref<128x32xbf16, #tpu.memory_space<vmem>>, %arg1: memref<32x128xbf16, #tpu.memory_space<vmem>>, %arg2: memref<128x128xf32, #tpu.memory_space<vmem>>) attributes {dimension_semantics = [], scalar_prefetch = 0 : i64, scratch_operands = 0 : i64, tpu.core_type = #tpu.core_type<tc>} {
    %c0 = arith.constant 0 : index
    %c0_0 = arith.constant 0 : index
    %0 = vector.load %arg0[%c0, %c0_0] : memref<128x32xbf16, #tpu.memory_space<vmem>>, vector<128x32xbf16>
    %c0_1 = arith.constant 0 : index
    %c0_2 = arith.constant 0 : index
    %1 = vector.load %arg1[%c0_1, %c0_2] : memref<32x128xbf16, #tpu.memory_space<vmem>>, vector<32x128xbf16>
    %cst = arith.constant dense<0.000000e+00> : vector<128x128xf32>
    %2 = tpu.matmul %0, %1, %cst {dimension_numbers = #tpu.dot_dimension_numbers<[1], [0], [0], [1], [0, 0, 1, 1], [], []>} : vector<128x32xbf16>, vector<32x128xbf16>, vector<128x128xf32> -> vector<128x128xf32>
    %3 = arith.mulf %2, %2 : vector<128x128xf32>
    %cst_3 = arith.constant dense<0.000000e+00> : vector<128xf32>
    %4 = vector.multi_reduction <add>, %3, %cst_3 [1] : vector<128x128xf32> to vector<128xf32>
    %5 = vector.shape_cast %4 : vector<128xf32> to vector<128x1xf32>
    %cst_4 = arith.constant 9.99999993E-9 : f32
    %6 = vector.broadcast %cst_4 : f32 to vector<128x1xf32>
    %7 = arith.addf %5, %6 : vector<128x1xf32>
    %8 = math.rsqrt %7 : vector<128x1xf32>
    %9 = vector.broadcast %8 : vector<128x1xf32> to vector<128x128xf32>
    %10 = arith.mulf %2, %9 : vector<128x128xf32>
    %c0_5 = arith.constant 0 : index
    %c0_6 = arith.constant 0 : index
    %11 = vector.load %arg2[%c0_5, %c0_6] : memref<128x128xf32, #tpu.memory_space<vmem>>, vector<128x128xf32>
    tpu.vector_store %arg2[%c0_5, %c0_6], %10 {strides = array<i32>} : memref<128x128xf32, #tpu.memory_space<vmem>>, vector<128x128xf32>,
    return
  }
}

</mosaic_0001>

<bundles_post_ra>
// kernel: tpu_custom_call.1
= control target key start
LH: loop header
LB: loop body
LE: loop exit
PB: predicated region body
PF: predicated region fallthrough
CT: control target
= control target key end

     0   :  { %vm85_vm0 = vcmask 261120   ;;  %s604_s0 = inlined_call_operand.vmem [shape: bf16[128,32], index: 0, kind: input, shape index: {}]   ;;  %s605_s1 = inlined_call_operand.vmem [shape: bf16[32,128], index: 1, kind: input, shape index: {}]   ;;  %s606_s2 = inlined_call_operand.hbm [shape: f32[128,128], index: 2, kind: output, shape index: {}]  }
   0x1   :  { %v390_v0 = vld [vmem:[%s605_s1] sm:$0xff]   ;;  %v391_v1 = vld [vmem:[%s605_s1 + $0x8] sm:$0xff]   ;;  %v396_v6 = vld [vmem:[%s604_s0 + $0x10] sm:$0xff]  }
   0x2   :  { %363 = vmatprep.subr.bf16.mxu0 %v390_v0  ;;  %383 = vmatprep.subr.bf16.mxu1 %v390_v0  ;;  %v392_v2 = vld [vmem:[%s604_s0] sm:$0xff]   ;;  %v394_v4 = vld [vmem:[%s604_s0 + $0x8] sm:$0xff]   ;;  %v398_v7 = vld [vmem:[%s604_s0 + $0x30] sm:$0xff]  }
   0x3   :  { %364 = vmatpush3.bf16.msra.mxu0 %v390_v0  ;;  %385 = vmatpush3.bf16.msra.mxu1 %v390_v0  ;;  %v393_v3 = vld [vmem:[%s604_s0 + $0x20] sm:$0xff]   ;;  %v395_v5 = vld [vmem:[%s604_s0 + $0x28] sm:$0xff]  }
   0x4   :  { %365 = vmatprep.subr.bf16.mxu0 %v391_v1  ;;  %384 = vmatprep.subr.bf16.mxu1 %v391_v1 }
   0x5   :  { %367 = vmatprep.mubr.msk.bf16.mxu0 %vm85_vm0, %v392_v2  ;;  %375 = vmatprep.mubr.msk.bf16.mxu1 %vm85_vm0, %v393_v3 }
   0x7   :  { %366 = vmatpush3.bf16.msra.mxu0 %v391_v1  ;;  %386 = vmatpush3.bf16.msra.mxu1 %v391_v1 }
   0xa   :  { %368 = vmatmul.mubr.msk.bf16.vlgmr.msra.gmra.mrb[0].mxu0 %vm85_vm0, %v394_v4  ;;  %376 = vmatmul.mubr.msk.bf16.vlgmr.msra.gmra.mrb[0].mxu1 %vm85_vm0, %v395_v5 }
   0xb   :  { %7 = vsyncpa [#allocation3], 0  ;;  %371 = vmatprep.mubr.msk.bf16.mxu0 %vm85_vm0, %v396_v6  ;;  %379 = vmatprep.mubr.msk.bf16.mxu1 %vm85_vm0, %v398_v7  ;;  %v397_v8 = vld [vmem:[%s604_s0 + $0x18] sm:$0xff]  }
   0xc   :  { %v399_v9 = vld [vmem:[%s604_s0 + $0x38] sm:$0xff]   ;;  %s456_s0 = smov [#allocation2]  }
   0xd   :  { %s324_s28 = sshll.u32 %s456_s0, 4  ;;  %s325_s28 = int_to_ptr.vmem [resolvable:$true] %s324_s28 }
   0xe   :  { %s432_s29 = scalar_lea.vmem %s325_s28, 2048  ;;  %p437_p1 = scmp.lt.s32.totalorder %s325_s28, %s325_s28 }
   0xf   :  { %p433_p0 = scmp.ne.s32.totalorder %s325_s28, %s432_s29  ;;  %p438_p2 = scmp.lt.s32.totalorder %s432_s29, %s432_s29 }
  0x11   :  { %p439_p3 = por %p438_p2, %p437_p1 }
  0x12   :  { %372 = vmatmul.mubr.msk.bf16.gmra.mrb[4].mxu0 %vm85_vm0, %v397_v8  ;;  %380 = vmatmul.mubr.msk.bf16.gmra.mrb[4].mxu1 %vm85_vm0, %v399_v9 }
  0x13   :  { %p440_p4 = pnand %p439_p3, %p433_p0 }
  0xdd   :  { %v512_v10 = vpop.f32.mrb[0].mxu0  ;;  %v514_v11 = vpop.f32.mrb[0].mxu1 }
  0xde   :  { %v516_v12 = vpop.f32.mrb[1].mxu0  ;;  %v518_v13 = vpop.f32.mrb[1].mxu1  ;;  %v217_v14 = vmul.f32 %v514_v11, %v514_v11  ;;  %v209_v15 = vmul.f32 %v512_v10, %v512_v10 }
  0xdf   :  { %v524_v16 = vpop.f32.mrb[2].mxu0  ;;  %v526_v17 = vpop.f32.mrb[2].mxu1  ;;  %v207_v20 = vmul.f32 %v516_v12, %v516_v12  ;;  %v215_v24 = vmul.f32 %v518_v13, %v518_v13 }
  0xe0   :  { %243 = vadd.xlane.f32.xlu0 %v217_v14  ;;  %v528_v18 = vpop.f32.mrb[3].mxu1  ;;  %227 = vadd.xlane.f32.xlu1 %v209_v15  ;;  %v530_v19 = vpop.f32.mrb[3].mxu0  ;;  %v210_v21 = vmul.f32 %v524_v16, %v524_v16  ;;  %v218_v25 = vmul.f32 %v526_v17, %v526_v17 }
  0xe1   :  { %v216_v32 = vmul.f32 %v528_v18, %v528_v18  ;;  %v208_v33 = vmul.f32 %v530_v19, %v530_v19 }
  0xe4   :  { %223 = vadd.xlane.f32.xlu0 %v207_v20  ;;  %229 = vadd.xlane.f32.xlu1 %v210_v21 }
  0xe5   :  { %v536_v22 = vpop.f32.mrb[4].mxu0  ;;  %v538_v23 = vpop.f32.mrb[4].mxu1 }
  0xe6   :  { %v544_v26 = vpop.f32.mrb[5].mxu0  ;;  %v546_v27 = vpop.f32.mrb[5].mxu1  ;;  %v213_v34 = vmul.f32 %v536_v22, %v536_v22  ;;  %v221_v40 = vmul.f32 %v538_v23, %v538_v23 }
  0xe7   :  { %v548_v28 = vpop.f32.mrb[6].mxu0  ;;  %v550_v29 = vpop.f32.mrb[6].mxu1  ;;  %v211_v37 = vmul.f32 %v544_v26, %v544_v26  ;;  %v219_v39 = vmul.f32 %v546_v27, %v546_v27 }
  0xe8   :  { %239 = vadd.xlane.f32.xlu0 %v215_v24  ;;  %245 = vadd.xlane.f32.xlu1 %v218_v25  ;;  %v552_v30 = vpop.f32.mrb[7].mxu0  ;;  %v554_v31 = vpop.f32.mrb[7].mxu1  ;;  %v214_v35 = vmul.f32 %v548_v28, %v548_v28  ;;  %v222_v41 = vmul.f32 %v550_v29, %v550_v29 }
  0xe9   :  { %v212_v36 = vmul.f32 %v552_v30, %v552_v30  ;;  %v220_v38 = vmul.f32 %v554_v31, %v554_v31 }
  0xec   :  { %241 = vadd.xlane.f32.xlu1 %v216_v32  ;;  %225 = vadd.xlane.f32.xlu0 %v208_v33 }
  0xf0   :  { %235 = vadd.xlane.f32.xlu0 %v213_v34  ;;  %237 = vadd.xlane.f32.xlu1 %v214_v35 }
  0xf4   :  { %231 = vadd.xlane.f32.xlu0 %v211_v37  ;;  %233 = vadd.xlane.f32.xlu1 %v212_v36 }
  0xf8   :  { %247 = vadd.xlane.f32.xlu0 %v219_v39  ;;  %249 = vadd.xlane.f32.xlu1 %v220_v38 }
  0xfc   :  { %251 = vadd.xlane.f32.xlu0 %v221_v40  ;;  %253 = vadd.xlane.f32.xlu1 %v222_v41 }
 0x16d   :  { %v244_v42 = vpop.xlane.xlu0 %243  ;;  %v228_v43 = vpop.xlane.xlu1 %227 }
 0x16e   :  { %v265_v44 = vadd.f32 1e-08, %v244_v42  ;;  %v257_v45 = vadd.f32 1e-08, %v228_v43 }
 0x170   :  { %400 = vrsqrt.f32 %v265_v44 }
 0x171   :  { %402 = vrsqrt.f32 %v257_v45  ;;  %v224_v46 = vpop.xlane.xlu0 %223  ;;  %v230_v47 = vpop.xlane.xlu1 %229 }
 0x172   :  { %v255_v48 = vadd.f32 1e-08, %v224_v46  ;;  %v258_v49 = vadd.f32 1e-08, %v230_v47 }
 0x174   :  { %404 = vrsqrt.f32 %v255_v48 }
 0x175   :  { %406 = vrsqrt.f32 %v258_v49  ;;  %v240_v50 = vpop.xlane.xlu0 %239  ;;  %v246_v51 = vpop.xlane.xlu1 %245 }
 0x176   :  { %v263_v52 = vadd.f32 1e-08, %v240_v50  ;;  %v266_v53 = vadd.f32 1e-08, %v246_v51 }
 0x178   :  { %408 = vrsqrt.f32 %v263_v52 }
 0x179   :  { %410 = vrsqrt.f32 %v266_v53  ;;  %v242_v54 = vpop.xlane.xlu1 %241  ;;  %v226_v55 = vpop.xlane.xlu0 %225 }
 0x17a   :  { %v401_v56 = vpop.eup %400  ;;  %v264_v57 = vadd.f32 1e-08, %v242_v54  ;;  %v256_v58 = vadd.f32 1e-08, %v226_v55 }
 0x17b   :  { %v403_v59 = vpop.eup %402  ;;  %v297_v60 = vmul.f32 %v401_v56, %v514_v11 }
 0x17c   :  { %v289_v61 = vmul.f32 %v403_v59, %v512_v10  ;;  %412 = vrsqrt.f32 %v264_v57 }
 0x17d   :  { %313 = vst [vmem:[#allocation2 + $0x50] sm:$0xff] %v297_v60  ;;  %414 = vrsqrt.f32 %v256_v58  ;;  %v236_v62 = vpop.xlane.xlu0 %235  ;;  %v238_v63 = vpop.xlane.xlu1 %237 }
 0x17e   :  { %v405_v0 = vpop.eup %404  ;;  %305 = vst [vmem:[#allocation2 + $0x10] sm:$0xff] %v289_v61  ;;  %v261_v1 = vadd.f32 1e-08, %v236_v62  ;;  %v262_v2 = vadd.f32 1e-08, %v238_v63 }
 0x17f   :  { %v407_v3 = vpop.eup %406  ;;  %v287_v4 = vmul.f32 %v405_v0, %v516_v12 }
 0x180   :  { %v290_v5 = vmul.f32 %v407_v3, %v524_v16  ;;  %416 = vrsqrt.f32 %v261_v1 }
 0x181   :  { %303 = vst [vmem:[#allocation2] sm:$0xff] %v287_v4  ;;  %418 = vrsqrt.f32 %v262_v2  ;;  %v232_v6 = vpop.xlane.xlu0 %231  ;;  %v234_v7 = vpop.xlane.xlu1 %233 }
 0x182   :  { %v409_v8 = vpop.eup %408  ;;  %306 = vst [vmem:[#allocation2 + $0x18] sm:$0xff] %v290_v5  ;;  %v259_v9 = vadd.f32 1e-08, %v232_v6  ;;  %v260_v10 = vadd.f32 1e-08, %v234_v7 }
 0x183   :  { %v411_v11 = vpop.eup %410  ;;  %v295_v14 = vmul.f32 %v409_v8, %v518_v13 }
 0x184   :  { %v298_v15 = vmul.f32 %v411_v11, %v526_v17  ;;  %420 = vrsqrt.f32 %v259_v9 }
 0x185   :  { %311 = vst [vmem:[#allocation2 + $0x40] sm:$0xff] %v295_v14  ;;  %422 = vrsqrt.f32 %v260_v10  ;;  %v248_v12 = vpop.xlane.xlu0 %247  ;;  %v250_v20 = vpop.xlane.xlu1 %249 }
 0x186   :  { %v413_v16 = vpop.eup %412  ;;  %314 = vst [vmem:[#allocation2 + $0x58] sm:$0xff] %v298_v15  ;;  %v267_v21 = vadd.f32 1e-08, %v248_v12  ;;  %v268_v24 = vadd.f32 1e-08, %v250_v20 }
 0x187   :  { %v415_v25 = vpop.eup %414  ;;  %v296_v32 = vmul.f32 %v413_v16, %v528_v18 }
 0x188   :  { %v288_v33 = vmul.f32 %v415_v25, %v530_v19  ;;  %424 = vrsqrt.f32 %v267_v21 }
 0x189   :  { %312 = vst [vmem:[#allocation2 + $0x48] sm:$0xff] %v296_v32  ;;  %426 = vrsqrt.f32 %v268_v24  ;;  %v252_v13 = vpop.xlane.xlu0 %251  ;;  %v254_v34 = vpop.xlane.xlu1 %253 }
 0x18a   :  { %v417_v17 = vpop.eup %416  ;;  %304 = vst [vmem:[#allocation2 + $0x8] sm:$0xff] %v288_v33  ;;  %v269_v35 = vadd.f32 1e-08, %v252_v13  ;;  %v270_v36 = vadd.f32 1e-08, %v254_v34 }
 0x18b   :  { %v419_v37 = vpop.eup %418  ;;  %v293_v38 = vmul.f32 %v417_v17, %v536_v22 }
 0x18c   :  { %v294_v39 = vmul.f32 %v419_v37, %v548_v28  ;;  %428 = vrsqrt.f32 %v269_v35 }
 0x18d   :  { %309 = vst [vmem:[#allocation2 + $0x30] sm:$0xff] %v293_v38  ;;  %430 = vrsqrt.f32 %v270_v36 }
 0x18e   :  { %v421_v18 = vpop.eup %420  ;;  %310 = vst [vmem:[#allocation2 + $0x38] sm:$0xff] %v294_v39 }
 0x18f   :  { %v423_v19 = vpop.eup %422  ;;  %v291_v40 = vmul.f32 %v421_v18, %v544_v26 }
 0x190   :  { %v292_v41 = vmul.f32 %v423_v19, %v552_v30 }
 0x191   :  { %307 = vst [vmem:[#allocation2 + $0x20] sm:$0xff] %v291_v40 }
 0x192   :  { %v425_v42 = vpop.eup %424  ;;  %308 = vst [vmem:[#allocation2 + $0x28] sm:$0xff] %v292_v41 }
 0x193   :  { %v427_v43 = vpop.eup %426  ;;  %v299_v44 = vmul.f32 %v425_v42, %v546_v27 }
 0x194   :  { %v300_v22 = vmul.f32 %v427_v43, %v554_v31 }
 0x195   :  { %315 = vst [vmem:[#allocation2 + $0x60] sm:$0xff] %v299_v44 }
 0x196   :  { %v429_v28 = vpop.eup %428  ;;  %316 = vst [vmem:[#allocation2 + $0x68] sm:$0xff] %v300_v22 }
 0x197   :  { %v431_v45 = vpop.eup %430  ;;  %v301_v46 = vmul.f32 %v429_v28, %v538_v23 }
 0x198   :  { %v302_v26 = vmul.f32 %v431_v45, %v550_v29 }
 0x199   :  { %317 = vst [vmem:[#allocation2 + $0x70] sm:$0xff] %v301_v46 }
 0x19a   :  { %318 = vst [vmem:[#allocation2 + $0x78] sm:$0xff] %v302_v26 }
 0x19b   :  { %443 = shalt.err (!%p440_p4)
}
 0x19c   :  { %s444_s4 = scalar_lea.hbm %s606_s2, 2048 }
 0x19d   :  { %p445_p5 = scmp.ne.s32.totalorder %s606_s2, %s444_s4  ;;  %p448_p6 = scmp.lt.u32.totalorder %s444_s4, %s606_s2 }
 0x19f   :  { %p450_p7 = pnand %p448_p6, %p445_p5 }
 0x1a1   :  { %453 = shalt.err (!%p450_p7)
}
 0x1a2   :  { %s457_s9 = smov 128   ;;  %s458_s10 = smov 8  }
 0x1a3   :  { %330 = dma.vmem_to_hbm [thread:$0]  %s325_s28, 2048, %s606_s2, [#allocation3], %s457_s9, %s457_s9, %s458_s10  }
 0x1a4   :  { %454 = dma.done.wait [#allocation3], 2048  }
 0x1a5   :  { %455 = vsyncadd [#allocation3], 4294965248 }
 0x1a6   :  { %334 = vsyncpa [#allocation3], 1 }

</bundles_post_ra>
